<compile_context>
chip_gen: v7x
topology: tpu7x:2x2x1
jax: 0.10.0
libtpu: 0.0.40
codegen_flags: <defaults>
</compile_context>

<pallas_src>
import jax
import jax.numpy as jnp
from jax.experimental import pallas as pl
from jax.experimental.pallas import tpu as pltpu


IN_FEATURES = 150
PAD_WIDTH = 128          # padded hidden / output width (one full lane group)
OUT_FEATURES = 20        # real output width of the final Linear
DEFAULT_TILE_B = 1024    # rows per grid step (multiple of 8)


def _round_up(n, m):
    return ((n + m - 1) // m) * m


def mlp_kernel(x_ref, w1_ref, b1_ref, w2_ref, b2_ref, w3_ref, b3_ref,
               w4_ref, b4_ref, o_ref):
    compute_dtype = w1_ref.dtype  # bf16 MXU inputs, f32 accumulation

    # Layer 1: (TILE_B,150) @ (150,128) -> f32, bias + ReLU in f32
    h = jnp.dot(x_ref[...], w1_ref[...], preferred_element_type=jnp.float32)
    h = jnp.maximum(h + b1_ref[...], 0.0)

    # Layer 2: (TILE_B,128) @ (128,128)
    h = jnp.dot(h.astype(compute_dtype), w2_ref[...],
                preferred_element_type=jnp.float32)
    h = jnp.maximum(h + b2_ref[...], 0.0)

    # Layer 3: (TILE_B,128) @ (128,128)
    h = jnp.dot(h.astype(compute_dtype), w3_ref[...],
                preferred_element_type=jnp.float32)
    h = jnp.maximum(h + b3_ref[...], 0.0)

    # Layer 4 (no activation): (TILE_B,128) @ (128,128); cols 20..127 are zero.
    h = jnp.dot(h.astype(compute_dtype), w4_ref[...],
                preferred_element_type=jnp.float32)
    o_ref[...] = (h + b4_ref[...]).astype(o_ref.dtype)


def pack_params(params, compute_dtype=jnp.bfloat16):
    """Zero-pad all hidden/output widths to PAD_WIDTH and cast weights to
    bf16 (biases stay f32 for the f32 epilogue).  Weights are stored
    (in_features, out_features)."""
    def pad2d(a, rows, cols):
        out = jnp.zeros((rows, cols), a.dtype)
        return out.at[: a.shape[0], : a.shape[1]].set(a)

    packed = {
        "w1": pad2d(params["w1"], IN_FEATURES, PAD_WIDTH).astype(compute_dtype),
        "b1": pad2d(params["b1"], 1, PAD_WIDTH).astype(jnp.float32),
        "w2": pad2d(params["w2"], PAD_WIDTH, PAD_WIDTH).astype(compute_dtype),
        "b2": pad2d(params["b2"], 1, PAD_WIDTH).astype(jnp.float32),
        "w3": pad2d(params["w3"], PAD_WIDTH, PAD_WIDTH).astype(compute_dtype),
        "b3": pad2d(params["b3"], 1, PAD_WIDTH).astype(jnp.float32),
        "w4": pad2d(params["w4"], PAD_WIDTH, PAD_WIDTH).astype(compute_dtype),
        "b4": pad2d(params["b4"], 1, PAD_WIDTH).astype(jnp.float32),
    }
    return packed


def classifier_mlp_forward(x, packed, tile_b=DEFAULT_TILE_B):
    """x: (B, 150) float32.  packed: output of pack_params().  Returns (B, 20) f32."""
    B = x.shape[0]
    assert x.shape[1] == IN_FEATURES

    compute_dtype = packed["w1"].dtype

    # Pick a tile size: multiple of 8, no larger than needed for this batch.
    tile_b = min(tile_b, _round_up(B, 8))
    b_pad = _round_up(B, tile_b)

    x_p = x
    if b_pad != B:
        x_p = jnp.zeros((b_pad, IN_FEATURES), x.dtype).at[:B].set(x)
    x_p = x_p.astype(compute_dtype)  # bf16 halves the dominant HBM stream

    grid = (b_pad // tile_b,)

    def resident(shape):
        # Whole-array block, same block for every grid step -> DMA'd once.
        return pl.BlockSpec(shape, lambda i: (0, 0))

    out = pl.pallas_call(
        mlp_kernel,
        out_shape=jax.ShapeDtypeStruct((b_pad, PAD_WIDTH), jnp.float32),
        grid=grid,
        in_specs=[
            pl.BlockSpec((tile_b, IN_FEATURES), lambda i: (i, 0)),
            resident((IN_FEATURES, PAD_WIDTH)), resident((1, PAD_WIDTH)),
            resident((PAD_WIDTH, PAD_WIDTH)),   resident((1, PAD_WIDTH)),
            resident((PAD_WIDTH, PAD_WIDTH)),   resident((1, PAD_WIDTH)),
            resident((PAD_WIDTH, PAD_WIDTH)),   resident((1, PAD_WIDTH)),
        ],
        out_specs=pl.BlockSpec((tile_b, PAD_WIDTH), lambda i: (i, 0)),
        compiler_params=pltpu.CompilerParams(
            dimension_semantics=("parallel",)),
    )(
        x_p,
        packed["w1"], packed["b1"],
        packed["w2"], packed["b2"],
        packed["w3"], packed["b3"],
        packed["w4"], packed["b4"],
    )
    # Strip batch padding and the 108 zero output columns.
    return out[:B, :OUT_FEATURES]


def init_params(key):
    """Deterministic init mimicking PyTorch Linear default (uniform ±1/sqrt(fan_in)).
    Weights stored as (in_features, out_features); biases as (1, out_features)."""
    dims = [(150, 100), (100, 50), (50, 50), (50, 20)]
    params = {}
    keys = jax.random.split(key, 2 * len(dims))
    for i, (fan_in, fan_out) in enumerate(dims):
        bound = 1.0 / (fan_in ** 0.5)
        params[f"w{i+1}"] = jax.random.uniform(
            keys[2 * i], (fan_in, fan_out), jnp.float32, -bound, bound)
        params[f"b{i+1}"] = jax.random.uniform(
            keys[2 * i + 1], (1, fan_out), jnp.float32, -bound, bound)
    return params


def reference_forward(x, params):
    """Pure-f32 reference matching the PyTorch module."""
    h = x
    for i in range(1, 4):
        h = jnp.maximum(h @ params[f"w{i}"] + params[f"b{i}"], 0.0)
    return h @ params["w4"] + params["b4"]


if __name__ == "__main__":
    key = jax.random.PRNGKey(0)
    pkey, xkey = jax.random.split(key)
    params = init_params(pkey)
    packed = pack_params(params)

    B = 8
    x = jax.random.normal(xkey, (B, IN_FEATURES), dtype=jnp.float32)

    out = classifier_mlp_forward(x, packed)
    out = jax.block_until_ready(out)

    ref = reference_forward(x, params)
    assert out.shape == (B, OUT_FEATURES), out.shape
    # bf16 inputs with f32 accumulation: ~3 decimal digits of agreement.
    assert jnp.allclose(out, ref, atol=2e-2, rtol=2e-2), "mismatch vs JAX reference"

    print("KERNEL_OK")
</pallas_src>

<mosaic_0001>
module attributes {stable_mosaic.version = 11 : i64} {
  func.func @mlp_kernel(%arg0: i32, %arg1: memref<8x150xbf16, #tpu.memory_space<vmem>>, %arg2: memref<150x128xbf16, #tpu.memory_space<vmem>>, %arg3: memref<1x128xf32, #tpu.memory_space<vmem>>, %arg4: memref<128x128xbf16, #tpu.memory_space<vmem>>, %arg5: memref<1x128xf32, #tpu.memory_space<vmem>>, %arg6: memref<128x128xbf16, #tpu.memory_space<vmem>>, %arg7: memref<1x128xf32, #tpu.memory_space<vmem>>, %arg8: memref<128x128xbf16, #tpu.memory_space<vmem>>, %arg9: memref<1x128xf32, #tpu.memory_space<vmem>>, %arg10: memref<8x128xf32, #tpu.memory_space<vmem>>) attributes {dimension_semantics = [#tpu.dimension_semantics<parallel>], iteration_bounds = array<i64: 1>, scalar_prefetch = 0 : i64, scratch_operands = 0 : i64, tpu.core_type = #tpu.core_type<tc>, window_params = [{transform_indices = @transform_0, window_bounds = array<i64: 8, 150>}, {pipeline_mode = #tpu.pipeline_mode<synchronous>, transform_indices = @transform_1, window_bounds = array<i64: 150, 128>}, {pipeline_mode = #tpu.pipeline_mode<synchronous>, transform_indices = @transform_2, window_bounds = array<i64: 1, 128>}, {pipeline_mode = #tpu.pipeline_mode<synchronous>, transform_indices = @transform_3, window_bounds = array<i64: 128, 128>}, {pipeline_mode = #tpu.pipeline_mode<synchronous>, transform_indices = @transform_4, window_bounds = array<i64: 1, 128>}, {pipeline_mode = #tpu.pipeline_mode<synchronous>, transform_indices = @transform_5, window_bounds = array<i64: 128, 128>}, {pipeline_mode = #tpu.pipeline_mode<synchronous>, transform_indices = @transform_6, window_bounds = array<i64: 1, 128>}, {pipeline_mode = #tpu.pipeline_mode<synchronous>, transform_indices = @transform_7, window_bounds = array<i64: 128, 128>}, {pipeline_mode = #tpu.pipeline_mode<synchronous>, transform_indices = @transform_8, window_bounds = array<i64: 1, 128>}, {transform_indices = @transform_9, window_bounds = array<i64: 8, 128>}]} {
    %c0 = arith.constant 0 : index
    %c0_0 = arith.constant 0 : index
    %0 = vector.load %arg1[%c0, %c0_0] : memref<8x150xbf16, #tpu.memory_space<vmem>>, vector<8x150xbf16>
    %c0_1 = arith.constant 0 : index
    %c0_2 = arith.constant 0 : index
    %1 = vector.load %arg2[%c0_1, %c0_2] : memref<150x128xbf16, #tpu.memory_space<vmem>>, vector<150x128xbf16>
    %cst = arith.constant dense<0.000000e+00> : vector<8x128xf32>
    %2 = tpu.matmul %0, %1, %cst {dimension_numbers = #tpu.dot_dimension_numbers<[1], [0], [0], [1], [0, 0, 1, 1], [], []>} : vector<8x150xbf16>, vector<150x128xbf16>, vector<8x128xf32> -> vector<8x128xf32>
    %c0_3 = arith.constant 0 : index
    %c0_4 = arith.constant 0 : index
    %3 = vector.load %arg3[%c0_3, %c0_4] : memref<1x128xf32, #tpu.memory_space<vmem>>, vector<1x128xf32>
    %4 = vector.broadcast %3 : vector<1x128xf32> to vector<8x128xf32>
    %5 = arith.addf %2, %4 : vector<8x128xf32>
    %cst_5 = arith.constant 0.000000e+00 : f32
    %6 = vector.broadcast %cst_5 : f32 to vector<8x128xf32>
    %7 = arith.maximumf %5, %6 : vector<8x128xf32>
    %8 = arith.truncf %7 : vector<8x128xf32> to vector<8x128xbf16>
    %c0_6 = arith.constant 0 : index
    %c0_7 = arith.constant 0 : index
    %9 = vector.load %arg4[%c0_6, %c0_7] : memref<128x128xbf16, #tpu.memory_space<vmem>>, vector<128x128xbf16>
    %cst_8 = arith.constant dense<0.000000e+00> : vector<8x128xf32>
    %10 = tpu.matmul %8, %9, %cst_8 {dimension_numbers = #tpu.dot_dimension_numbers<[1], [0], [0], [1], [0, 0, 1, 1], [], []>} : vector<8x128xbf16>, vector<128x128xbf16>, vector<8x128xf32> -> vector<8x128xf32>
    %c0_9 = arith.constant 0 : index
    %c0_10 = arith.constant 0 : index
    %11 = vector.load %arg5[%c0_9, %c0_10] : memref<1x128xf32, #tpu.memory_space<vmem>>, vector<1x128xf32>
    %12 = vector.broadcast %11 : vector<1x128xf32> to vector<8x128xf32>
    %13 = arith.addf %10, %12 : vector<8x128xf32>
    %cst_11 = arith.constant 0.000000e+00 : f32
    %14 = vector.broadcast %cst_11 : f32 to vector<8x128xf32>
    %15 = arith.maximumf %13, %14 : vector<8x128xf32>
    %16 = arith.truncf %15 : vector<8x128xf32> to vector<8x128xbf16>
    %c0_12 = arith.constant 0 : index
    %c0_13 = arith.constant 0 : index
    %17 = vector.load %arg6[%c0_12, %c0_13] : memref<128x128xbf16, #tpu.memory_space<vmem>>, vector<128x128xbf16>
    %cst_14 = arith.constant dense<0.000000e+00> : vector<8x128xf32>
    %18 = tpu.matmul %16, %17, %cst_14 {dimension_numbers = #tpu.dot_dimension_numbers<[1], [0], [0], [1], [0, 0, 1, 1], [], []>} : vector<8x128xbf16>, vector<128x128xbf16>, vector<8x128xf32> -> vector<8x128xf32>
    %c0_15 = arith.constant 0 : index
    %c0_16 = arith.constant 0 : index
    %19 = vector.load %arg7[%c0_15, %c0_16] : memref<1x128xf32, #tpu.memory_space<vmem>>, vector<1x128xf32>
    %20 = vector.broadcast %19 : vector<1x128xf32> to vector<8x128xf32>
    %21 = arith.addf %18, %20 : vector<8x128xf32>
    %cst_17 = arith.constant 0.000000e+00 : f32
    %22 = vector.broadcast %cst_17 : f32 to vector<8x128xf32>
    %23 = arith.maximumf %21, %22 : vector<8x128xf32>
    %24 = arith.truncf %23 : vector<8x128xf32> to vector<8x128xbf16>
    %c0_18 = arith.constant 0 : index
    %c0_19 = arith.constant 0 : index
    %25 = vector.load %arg8[%c0_18, %c0_19] : memref<128x128xbf16, #tpu.memory_space<vmem>>, vector<128x128xbf16>
    %cst_20 = arith.constant dense<0.000000e+00> : vector<8x128xf32>
    %26 = tpu.matmul %24, %25, %cst_20 {dimension_numbers = #tpu.dot_dimension_numbers<[1], [0], [0], [1], [0, 0, 1, 1], [], []>} : vector<8x128xbf16>, vector<128x128xbf16>, vector<8x128xf32> -> vector<8x128xf32>
    %c0_21 = arith.constant 0 : index
    %c0_22 = arith.constant 0 : index
    %27 = vector.load %arg9[%c0_21, %c0_22] : memref<1x128xf32, #tpu.memory_space<vmem>>, vector<1x128xf32>
    %28 = vector.broadcast %27 : vector<1x128xf32> to vector<8x128xf32>
    %29 = arith.addf %26, %28 : vector<8x128xf32>
    %c0_23 = arith.constant 0 : index
    %c0_24 = arith.constant 0 : index
    %30 = vector.load %arg10[%c0_23, %c0_24] : memref<8x128xf32, #tpu.memory_space<vmem>>, vector<8x128xf32>
    tpu.vector_store %arg10[%c0_23, %c0_24], %29 {strides = array<i32>} : memref<8x128xf32, #tpu.memory_space<vmem>>, vector<8x128xf32>,
    return
  }
  func.func @transform_0(%arg0: i32) -> (i32, i32) {
    %c0_i32 = arith.constant 0 : i32
    %c0_i32_0 = arith.constant 0 : i32
    return %arg0, %c0_i32 : i32, i32
  }
  func.func @transform_1(%arg0: i32) -> (i32, i32) {
    %c0_i32 = arith.constant 0 : i32
    %c0_i32_0 = arith.constant 0 : i32
    %c0_i32_1 = arith.constant 0 : i32
    return %c0_i32, %c0_i32_0 : i32, i32
  }
  func.func @transform_2(%arg0: i32) -> (i32, i32) {
    %c0_i32 = arith.constant 0 : i32
    %c0_i32_0 = arith.constant 0 : i32
    %c0_i32_1 = arith.constant 0 : i32
    return %c0_i32, %c0_i32_0 : i32, i32
  }
  func.func @transform_3(%arg0: i32) -> (i32, i32) {
    %c0_i32 = arith.constant 0 : i32
    %c0_i32_0 = arith.constant 0 : i32
    %c0_i32_1 = arith.constant 0 : i32
    return %c0_i32, %c0_i32_0 : i32, i32
  }
  func.func @transform_4(%arg0: i32) -> (i32, i32) {
    %c0_i32 = arith.constant 0 : i32
    %c0_i32_0 = arith.constant 0 : i32
    %c0_i32_1 = arith.constant 0 : i32
    return %c0_i32, %c0_i32_0 : i32, i32
  }
  func.func @transform_5(%arg0: i32) -> (i32, i32) {
    %c0_i32 = arith.constant 0 : i32
    %c0_i32_0 = arith.constant 0 : i32
    %c0_i32_1 = arith.constant 0 : i32
    return %c0_i32, %c0_i32_0 : i32, i32
  }
  func.func @transform_6(%arg0: i32) -> (i32, i32) {
    %c0_i32 = arith.constant 0 : i32
    %c0_i32_0 = arith.constant 0 : i32
    %c0_i32_1 = arith.constant 0 : i32
    return %c0_i32, %c0_i32_0 : i32, i32
  }
  func.func @transform_7(%arg0: i32) -> (i32, i32) {
    %c0_i32 = arith.constant 0 : i32
    %c0_i32_0 = arith.constant 0 : i32
    %c0_i32_1 = arith.constant 0 : i32
    return %c0_i32, %c0_i32_0 : i32, i32
  }
  func.func @transform_8(%arg0: i32) -> (i32, i32) {
    %c0_i32 = arith.constant 0 : i32
    %c0_i32_0 = arith.constant 0 : i32
    %c0_i32_1 = arith.constant 0 : i32
    return %c0_i32, %c0_i32_0 : i32, i32
  }
  func.func @transform_9(%arg0: i32) -> (i32, i32) {
    %c0_i32 = arith.constant 0 : i32
    %c0_i32_0 = arith.constant 0 : i32
    return %arg0, %c0_i32 : i32, i32
  }
}

</mosaic_0001>

<bundles_post_ra>
// kernel: tpu_custom_call.1
= control target key start
LH: loop header
LB: loop body
LE: loop exit
PB: predicated region body
PF: predicated region fallthrough
CT: control target
= control target key end

     0   :  { %14 = vsyncpa [#allocation3], 0  ;;  %s1094_s0 = inlined_call_operand.hbm [shape: bf16[8,150], index: 0, kind: input, shape index: {}]   ;;  %s1095_s1 = inlined_call_operand.hbm [shape: bf16[150,128], index: 1, kind: input, shape index: {}]   ;;  %s1096_s2 = inlined_call_operand.vmem [shape: f32[1,128], index: 2, kind: input, shape index: {}]   ;;  %s1097_s3 = inlined_call_operand.hbm [shape: bf16[128,128], index: 3, kind: input, shape index: {}]   ;;  %s1098_s4 = inlined_call_operand.vmem [shape: f32[1,128], index: 4, kind: input, shape index: {}]   ;;  %s1099_s5 = inlined_call_operand.hbm [shape: bf16[128,128], index: 5, kind: input, shape index: {}]   ;;  %s1100_s6 = inlined_call_operand.vmem [shape: f32[1,128], index: 6, kind: input, shape index: {}]   ;;  %s1101_s7 = inlined_call_operand.hbm [shape: bf16[128,128], index: 7, kind: input, shape index: {}]   ;;  %s1102_s8 = inlined_call_operand.vmem [shape: f32[1,128], index: 8, kind: input, shape index: {}]   ;;  %s1103_s9 = inlined_call_operand.hbm [shape: f32[8,128], index: 9, kind: output, shape index: {}]  }
   0x1   :  { %15 = vsyncpa [#allocation6], 0 }
   0x2   :  { %16 = vsyncpa [#allocation9], 0 }
   0x3   :  { %17 = vsyncpa [#allocation4], 0  ;;  %s910_s30 = smov [#allocation5]   ;;  %s770_s13 = scalar_lea.hbm %s1095_s1, 1216 }
   0x4   :  { %s33_s10 = sshll.u32 %s910_s30, 4  ;;  %p771_p0 = scmp.ne.s32.totalorder %s1095_s1, %s770_s13  ;;  %s34_s10 = int_to_ptr.vmem [resolvable:$true] %s33_s10 }
   0x5   :  { %p774_p1 = scmp.lt.u32.totalorder %s770_s13, %s1095_s1 }
   0x7   :  { %p776_p2 = pnand %p774_p1, %p771_p0 }
   0x9   :  { %779 = shalt.err (!%p776_p2)
}
   0xa   :  { %s780_s18 = scalar_lea.vmem %s34_s10, 1216  ;;  %p785_p4 = scmp.lt.s32.totalorder %s34_s10, %s34_s10 }
   0xb   :  { %p781_p3 = scmp.ne.s32.totalorder %s34_s10, %s780_s18  ;;  %p786_p5 = scmp.lt.s32.totalorder %s780_s18, %s780_s18 }
   0xd   :  { %p787_p6 = por %p786_p5, %p785_p4 }
   0xf   :  { %p788_p7 = pnand %p787_p6, %p781_p3 }
  0x11   :  { %791 = shalt.err (!%p788_p7)
}
  0x12   :  { %s911_s19 = smov 64   ;;  %s912_s20 = smov 4  }
  0x13   :  { %39 = dma.hbm_to_vmem [thread:$0]  %s1095_s1, 1216, %s34_s10, [#allocation6], %s911_s19, %s911_s19, %s912_s20  }
  0x14   :  { %s913_s23 = smov [#allocation8]   ;;  %s914_s25 = smov [#allocation2]  }
  0x15   :  { %s61_s24 = sshll.u32 %s913_s23, 4  ;;  %s24_s26 = sshll.u32 %s914_s25, 4  ;;  %s62_s24 = int_to_ptr.vmem [resolvable:$true] %s61_s24  ;;  %s25_s26 = int_to_ptr.vmem [resolvable:$true] %s24_s26 }
  0x16   :  { %s792_s29 = scalar_lea.hbm %s1099_s5, 1024 }
  0x17   :  { %p793_p8 = scmp.ne.s32.totalorder %s1099_s5, %s792_s29  ;;  %p796_p9 = scmp.lt.u32.totalorder %s792_s29, %s1099_s5 }
  0x19   :  { %p798_p10 = pnand %p796_p9, %p793_p8 }
  0x1b   :  { %801 = shalt.err (!%p798_p10)
}
  0x1c   :  { %s802_s1 = scalar_lea.vmem %s62_s24, 1024  ;;  %p807_p12 = scmp.lt.s32.totalorder %s62_s24, %s62_s24 }
  0x1d   :  { %p803_p11 = scmp.ne.s32.totalorder %s62_s24, %s802_s1  ;;  %p808_p13 = scmp.lt.s32.totalorder %s802_s1, %s802_s1 }
  0x1f   :  { %p809_p0 = por %p808_p13, %p807_p12 }
  0x21   :  { %p810_p1 = pnand %p809_p0, %p803_p11 }
  0x23   :  { %813 = shalt.err (!%p810_p1)
}
  0x24   :  { %67 = dma.hbm_to_vmem [thread:$0]  %s1099_s5, 1024, %s62_s24, [#allocation9], %s911_s19, %s911_s19, %s912_s20  }
  0x25   :  { %s814_s17 = scalar_lea.hbm %s1094_s0, 128 }
  0x26   :  { %p815_p2 = scmp.ne.s32.totalorder %s1094_s0, %s814_s17  ;;  %p818_p3 = scmp.lt.u32.totalorder %s814_s17, %s1094_s0 }
  0x28   :  { %p820_p4 = pnand %p818_p3, %p815_p2 }
  0x2a   :  { %823 = shalt.err (!%p820_p4)
}
  0x2b   :  { %s824_s25 = scalar_lea.vmem %s25_s26, 128  ;;  %p829_p6 = scmp.lt.s32.totalorder %s25_s26, %s25_s26 }
  0x2c   :  { %p825_p5 = scmp.ne.s32.totalorder %s25_s26, %s824_s25  ;;  %p830_p7 = scmp.lt.s32.totalorder %s824_s25, %s824_s25 }
  0x2e   :  { %p831_p8 = por %p830_p7, %p829_p6 }
  0x30   :  { %p832_p9 = pnand %p831_p8, %p825_p5 }
  0x32   :  { %835 = shalt.err (!%p832_p9)
}
  0x33   :  { %27 = dma.hbm_to_vmem [thread:$0]  %s1094_s0, 128, %s25_s26, [#allocation3]  }
  0x34   :  { %s915_s27 = smov [#allocation7]   ;;  %s916_s29 = smov [#allocation10]  }
  0x35   :  { %s47_s28 = sshll.u32 %s915_s27, 4  ;;  %s75_s30 = sshll.u32 %s916_s29, 4  ;;  %s48_s28 = int_to_ptr.vmem [resolvable:$true] %s47_s28  ;;  %s76_s30 = int_to_ptr.vmem [resolvable:$true] %s75_s30 }
  0x36   :  { %s836_s13 = scalar_lea.hbm %s1097_s3, 1024 }
  0x37   :  { %p837_p10 = scmp.ne.s32.totalorder %s1097_s3, %s836_s13  ;;  %p840_p11 = scmp.lt.u32.totalorder %s836_s13, %s1097_s3 }
  0x39   :  { %p842_p12 = pnand %p840_p11, %p837_p10 }
  0x3b   :  { %845 = shalt.err (!%p842_p12)
}
  0x3c   :  { %s846_s0 = scalar_lea.vmem %s48_s28, 1024  ;;  %p851_p0 = scmp.lt.s32.totalorder %s48_s28, %s48_s28 }
  0x3d   :  { %p847_p13 = scmp.ne.s32.totalorder %s48_s28, %s846_s0  ;;  %p852_p1 = scmp.lt.s32.totalorder %s846_s0, %s846_s0 }
  0x3f   :  { %p853_p2 = por %p852_p1, %p851_p0 }
  0x41   :  { %p854_p3 = pnand %p853_p2, %p847_p13 }
  0x43   :  { %857 = shalt.err (!%p854_p3)
}
  0x44   :  { %53 = dma.hbm_to_vmem [thread:$0]  %s1097_s3, 1024, %s48_s28, [#allocation6], %s911_s19, %s911_s19, %s912_s20  }
  0x45   :  { %s858_s21 = scalar_lea.hbm %s1101_s7, 1024 }
  0x46   :  { %p859_p4 = scmp.ne.s32.totalorder %s1101_s7, %s858_s21  ;;  %p862_p5 = scmp.lt.u32.totalorder %s858_s21, %s1101_s7 }
  0x48   :  { %p864_p6 = pnand %p862_p5, %p859_p4 }
  0x4a   :  { %867 = shalt.err (!%p864_p6)
}
  0x4b   :  { %s868_s24 = scalar_lea.vmem %s76_s30, 1024  ;;  %p873_p8 = scmp.lt.s32.totalorder %s76_s30, %s76_s30 }
  0x4c   :  { %p869_p7 = scmp.ne.s32.totalorder %s76_s30, %s868_s24  ;;  %p874_p9 = scmp.lt.s32.totalorder %s868_s24, %s868_s24 }
  0x4e   :  { %p875_p10 = por %p874_p9, %p873_p8 }
  0x50   :  { %p876_p11 = pnand %p875_p10, %p869_p7 }
  0x52   :  { %879 = shalt.err (!%p876_p11)
}
  0x53   :  { %81 = dma.hbm_to_vmem [thread:$0]  %s1101_s7, 1024, %s76_s30, [#allocation9], %s911_s19, %s911_s19, %s912_s20  }
  0x54   :  { %902 = dma.done.wait [#allocation3], 128  }
  0x55   :  { %903 = vsyncadd [#allocation3], 4294967168 }
  0x56   :  { %904 = dma.done.wait [#allocation6], 2240  }
  0x57   :  { %905 = vsyncadd [#allocation6], 4294965056 }
  0x58   :  { %906 = dma.done.wait [#allocation9], 2048  }
  0x59   :  { %907 = vsyncadd [#allocation9], 4294965248  ;;  %v917_v0 = vmov 0   ;;  %v918_v1 = vmov 0.0   ;;  %v734_v2 = vld [vmem:[#allocation5] sm:$0xff]   ;;  %v735_v3 = vld [vmem:[#allocation5 + $0x8] sm:$0xff]  }
  0x5a   :  { %198 = vmatprep.subr.bf16.mxu0 %v917_v0  ;;  %663 = vmatprep.subr.bf16.mxu1 %v918_v1  ;;  %v736_v4 = vld [vmem:[#allocation5 + $0x10] sm:$0xff]   ;;  %v737_v5 = vld [vmem:[#allocation5 + $0x18] sm:$0xff]   ;;  %vm190_vm0 = vcmask 179200   ;;  %v738_v10 = vld [vmem:[#allocation5 + $0x20] sm:$0xff]   ;;  %vm194_vm1 = vcmask 1042432   ;;  %vm919_vm2 = vmmov 0  }
  0x5b   :  { %199 = vmatpush1.bf16.msra.mxu0 %v734_v2  ;;  %v100_v6 = vld [vmem:[#allocation2] sm:$0xff]  ;;  %v746_v8 = vld [vmem:[#allocation7] sm:$0xff]   ;;  %v749_v13 = vld [vmem:[#allocation7 + $0x18] sm:$0xff]   ;;  %679 = vmatprep.mubr.msk.bf16.mxu1 %vm919_vm2, %v918_v1  ;;  %s920_s11 = smov [#allocation11]  }
  0x5c   :  { %200 = vmatprep.subr.bf16.mxu0 %v917_v0  ;;  %v597_v7 = vcombine.high %v100_v6, %v100_v6  ;;  %664 = vmatpush3.bf16.msra.mxu1 %v746_v8  ;;  %v747_v9 = vld [vmem:[#allocation7 + $0x8] sm:$0xff]   ;;  %v739_v11 = vld [vmem:[#allocation5 + $0x28] sm:$0xff]   ;;  %v748_v12 = vld [vmem:[#allocation7 + $0x10] sm:$0xff]   ;;  %v596_v21 = vcombine.low %v100_v6, %v100_v6  ;;  %s584_s12 = sshll.u32 %s920_s11, 4  ;;  %s585_s12 = int_to_ptr.vmem [resolvable:$true] %s584_s12 }
  0x5d   :  { %665 = vmatprep.subr.bf16.mxu1 %v918_v1  ;;  %v740_v14 = vld [vmem:[#allocation5 + $0x30] sm:$0xff]   ;;  %v741_v16 = vld [vmem:[#allocation5 + $0x38] sm:$0xff]   ;;  %v742_v18 = vld [vmem:[#allocation5 + $0x40] sm:$0xff]   ;;  %p885_p13 = scmp.lt.s32.totalorder %s585_s12, %s585_s12 }
  0x5e   :  { %608 = vmatprep.mubr.msk.bf16.mxu0 %vm190_vm0, %v597_v7  ;;  %v750_v15 = vld [vmem:[#allocation7 + $0x20] sm:$0xff]   ;;  %v751_v17 = vld [vmem:[#allocation7 + $0x28] sm:$0xff]   ;;  %v743_v19 = vld [vmem:[#allocation5 + $0x48] ss:$0 sps:$4 sm:$0x77]  }
  0x5f   :  { %201 = vmatpush1.bf16.msra.mxu0 %v735_v3  ;;  %v196_v20 = vsel %vm194_vm1, %v743_v19, 0  ;;  %v752_v22 = vld [vmem:[#allocation7 + $0x30] sm:$0xff]   ;;  %v753_v23 = vld [vmem:[#allocation7 + $0x38] sm:$0xff]   ;;  %v595_v24 = vld [vmem:[%s1096_s2] ss:$0 sm:$0xff] }
  0x60   :  { %202 = vmatprep.subr.bf16.mxu0 %v917_v0  ;;  %666 = vmatpush3.bf16.msra.mxu1 %v747_v9  ;;  %v754_v31 = vld [vmem:[#allocation8] sm:$0xff]   ;;  %v755_v33 = vld [vmem:[#allocation8 + $0x8] sm:$0xff]   ;;  %v756_v34 = vld [vmem:[#allocation8 + $0x10] sm:$0xff]  }
  0x61   :  { %667 = vmatprep.subr.bf16.mxu1 %v918_v1  ;;  %v757_v35 = vld [vmem:[#allocation8 + $0x18] sm:$0xff]   ;;  %v758_v36 = vld [vmem:[#allocation8 + $0x20] sm:$0xff]   ;;  %v759_v37 = vld [vmem:[#allocation8 + $0x28] sm:$0xff]  }
  0x62   :  { %v760_v38 = vld [vmem:[#allocation8 + $0x30] sm:$0xff]   ;;  %v761_v39 = vld [vmem:[#allocation8 + $0x38] sm:$0xff]   ;;  %v762_v40 = vld [vmem:[#allocation10] sm:$0xff]  }
  0x63   :  { %203 = vmatpush1.bf16.msra.mxu0 %v736_v4  ;;  %v763_v41 = vld [vmem:[#allocation10 + $0x8] sm:$0xff]   ;;  %v764_v42 = vld [vmem:[#allocation10 + $0x10] sm:$0xff]   ;;  %v765_v43 = vld [vmem:[#allocation10 + $0x18] sm:$0xff]  }
  0x64   :  { %204 = vmatprep.subr.bf16.mxu0 %v917_v0  ;;  %668 = vmatpush3.bf16.msra.mxu1 %v748_v12  ;;  %v766_v44 = vld [vmem:[#allocation10 + $0x20] sm:$0xff]   ;;  %v767_v45 = vld [vmem:[#allocation10 + $0x28] sm:$0xff]   ;;  %v768_v54 = vld [vmem:[#allocation10 + $0x30] sm:$0xff]  }
  0x65   :  { %669 = vmatprep.subr.bf16.mxu1 %v918_v1  ;;  %v609_v46 = vld [vmem:[%s1098_s4] ss:$0 sm:$0xff]  ;;  %v769_v55 = vld [vmem:[#allocation10 + $0x38] sm:$0xff]  }
  0x66   :  { %v618_v56 = vld [vmem:[%s1100_s6] ss:$0 sm:$0xff]  ;;  %s880_s6 = scalar_lea.vmem %s585_s12, 128 }
  0x67   :  { %205 = vmatpush1.bf16.msra.mxu0 %v737_v5  ;;  %p881_p12 = scmp.ne.s32.totalorder %s585_s12, %s880_s6  ;;  %p886_p0 = scmp.lt.s32.totalorder %s880_s6, %s880_s6 }
  0x68   :  { %206 = vmatprep.subr.bf16.mxu0 %v917_v0  ;;  %670 = vmatpush3.bf16.msra.mxu1 %v749_v13 }
  0x69   :  { %671 = vmatprep.subr.bf16.mxu1 %v918_v1  ;;  %p887_p1 = por %p886_p0, %p885_p13 }
  0x6b   :  { %207 = vmatpush1.bf16.msra.mxu0 %v738_v10  ;;  %p888_p2 = pnand %p887_p1, %p881_p12 }
  0x6c   :  { %208 = vmatprep.subr.bf16.mxu0 %v917_v0  ;;  %672 = vmatpush3.bf16.msra.mxu1 %v750_v15 }
  0x6d   :  { %673 = vmatprep.subr.bf16.mxu1 %v918_v1 }
  0x6f   :  { %209 = vmatpush1.bf16.msra.mxu0 %v739_v11 }
  0x70   :  { %210 = vmatprep.subr.bf16.mxu0 %v917_v0  ;;  %674 = vmatpush3.bf16.msra.mxu1 %v751_v17 }
  0x71   :  { %675 = vmatprep.subr.bf16.mxu1 %v918_v1 }
  0x73   :  { %211 = vmatpush1.bf16.msra.mxu0 %v740_v14 }
  0x74   :  { %212 = vmatprep.subr.bf16.mxu0 %v917_v0  ;;  %676 = vmatpush3.bf16.msra.mxu1 %v752_v22 }
  0x75   :  { %677 = vmatprep.subr.bf16.mxu1 %v918_v1 }
  0x77   :  { %213 = vmatpush1.bf16.msra.mxu0 %v741_v16 }
  0x78   :  { %214 = vmatprep.subr.bf16.mxu0 %v917_v0  ;;  %678 = vmatpush3.bf16.msra.mxu1 %v753_v23 }
  0x79   :  { %683 = vmatprep.subr.bf16.mxu1 %v918_v1 }
  0x7b   :  { %215 = vmatpush1.bf16.msra.mxu0 %v742_v18 }
  0x7c   :  { %216 = vmatprep.subr.bf16.mxu0 %v917_v0  ;;  %v627_v0 = vld [vmem:[%s1102_s8] ss:$0 sm:$0xff] }
  0x7f   :  { %217 = vmatpush1.bf16.msra.mxu0 %v196_v20 }
  0x80   :  { %703 = vmatprep.subr.bf16.mxu0 %v918_v1 }
  0x82   :  { %231 = vmatmul.mubr.bf16.vlgmr.msra.gmra.mrb[0].mxu0 %v596_v21 }
  0x83   :  { %719 = vmatprep.mubr.msk.bf16.mxu0 %vm919_vm2, %v918_v1  ;;  %704 = vmatpush3.bf16.msra.mxu0 %v762_v40 }
  0x84   :  { %705 = vmatprep.subr.bf16.mxu0 %v918_v1 }
  0x87   :  { %706 = vmatpush3.bf16.msra.mxu0 %v763_v41 }
  0x88   :  { %707 = vmatprep.subr.bf16.mxu0 %v918_v1 }
  0x8b   :  { %708 = vmatpush3.bf16.msra.mxu0 %v764_v42 }
  0x8c   :  { %709 = vmatprep.subr.bf16.mxu0 %v918_v1 }
  0x8f   :  { %710 = vmatpush3.bf16.msra.mxu0 %v765_v43 }
  0x90   :  { %711 = vmatprep.subr.bf16.mxu0 %v918_v1 }
  0x93   :  { %712 = vmatpush3.bf16.msra.mxu0 %v766_v44 }
  0x94   :  { %713 = vmatprep.subr.bf16.mxu0 %v918_v1 }
  0x97   :  { %714 = vmatpush3.bf16.msra.mxu0 %v767_v45 }
  0x98   :  { %715 = vmatprep.subr.bf16.mxu0 %v918_v1 }
  0x9b   :  { %716 = vmatpush3.bf16.msra.mxu0 %v768_v54 }
  0x9c   :  { %717 = vmatprep.subr.bf16.mxu0 %v918_v1 }
  0x9f   :  { %718 = vmatpush3.bf16.msra.mxu0 %v769_v55 }
 0x155   :  { %v232_v25 = vpop.f32.mrb[0].mxu0 }
 0x156   :  { %v233_v26 = vadd.f32 %v595_v24, %v232_v25  ;;  %v234_v27 = vpop.f32.mrb[1].mxu0 }
 0x157   :  { %v235_v28 = vpop.f32.mrb[2].mxu0 }
 0x158   :  { %v238_v29 = vmax.f32 %v233_v26, 0.0  ;;  %v236_v30 = vpop.f32.mrb[3].mxu0 }
 0x15a   :  { %v239_v32 = vpack.c.bf16 %v238_v29, %v238_v29 }
 0x15c   :  { %680 = vmatmul.mubr.bf16.vlgmr.msra.gmra.mrb[0].mxu1 %v239_v32 }
 0x15d   :  { %684 = vmatpush3.bf16.msra.mxu1 %v754_v31  ;;  %699 = vmatprep.mubr.msk.bf16.mxu1 %vm919_vm2, %v918_v1 }
 0x15e   :  { %685 = vmatprep.subr.bf16.mxu1 %v918_v1 }
 0x161   :  { %686 = vmatpush3.bf16.msra.mxu1 %v755_v33 }
 0x162   :  { %687 = vmatprep.subr.bf16.mxu1 %v918_v1 }
 0x165   :  { %688 = vmatpush3.bf16.msra.mxu1 %v756_v34 }
 0x166   :  { %689 = vmatprep.subr.bf16.mxu1 %v918_v1 }
 0x169   :  { %690 = vmatpush3.bf16.msra.mxu1 %v757_v35 }
 0x16a   :  { %691 = vmatprep.subr.bf16.mxu1 %v918_v1 }
 0x16d   :  { %692 = vmatpush3.bf16.msra.mxu1 %v758_v36 }
 0x16e   :  { %693 = vmatprep.subr.bf16.mxu1 %v918_v1 }
 0x171   :  { %694 = vmatpush3.bf16.msra.mxu1 %v759_v37 }
 0x172   :  { %695 = vmatprep.subr.bf16.mxu1 %v918_v1 }
 0x175   :  { %696 = vmatpush3.bf16.msra.mxu1 %v760_v38 }
 0x176   :  { %697 = vmatprep.subr.bf16.mxu1 %v918_v1 }
 0x179   :  { %698 = vmatpush3.bf16.msra.mxu1 %v761_v39 }
 0x22f   :  { %v345_v47 = vpop.f32.mrb[0].mxu1 }
 0x230   :  { %v346_v48 = vadd.f32 %v609_v46, %v345_v47  ;;  %v681_v49 = vpop.f32.mrb[1].mxu1 }
 0x231   :  { %v348_v50 = vpop.f32.mrb[2].mxu1 }
 0x232   :  { %v351_v51 = vmax.f32 %v346_v48, 0.0  ;;  %v682_v52 = vpop.f32.mrb[3].mxu1 }
 0x234   :  { %v352_v53 = vpack.c.bf16 %v351_v51, %v351_v51 }
 0x236   :  { %700 = vmatmul.mubr.bf16.vlgmr.msra.gmra.mrb[4].mxu1 %v352_v53 }
 0x309   :  { %v458_v57 = vpop.f32.mrb[4].mxu1 }
 0x30a   :  { %v459_v58 = vadd.f32 %v618_v56, %v458_v57  ;;  %v701_v59 = vpop.f32.mrb[5].mxu1 }
 0x30b   :  { %v461_v60 = vpop.f32.mrb[6].mxu1 }
 0x30c   :  { %v464_v61 = vmax.f32 %v459_v58, 0.0  ;;  %v702_v62 = vpop.f32.mrb[7].mxu1 }
 0x30e   :  { %v465_v63 = vpack.c.bf16 %v464_v61, %v464_v61 }
 0x310   :  { %720 = vmatmul.mubr.bf16.vlgmr.msra.gmra.mrb[4].mxu0 %v465_v63 }
 0x3e3   :  { %v571_v1 = vpop.f32.mrb[4].mxu0 }
 0x3e4   :  { %v572_v2 = vadd.f32 %v627_v0, %v571_v1  ;;  %v721_v3 = vpop.f32.mrb[5].mxu0 }
 0x3e5   :  { %v574_v4 = vpop.f32.mrb[6].mxu0 }
 0x3e6   :  { %577 = vst [vmem:[#allocation11] sm:$0xff] %v572_v2  ;;  %v722_v5 = vpop.f32.mrb[7].mxu0 }
 0x3e7   :  { %891 = shalt.err (!%p888_p2)
}
 0x3e8   :  { %s892_s8 = scalar_lea.hbm %s1103_s9, 128 }
 0x3e9   :  { %p893_p3 = scmp.ne.s32.totalorder %s1103_s9, %s892_s8  ;;  %p896_p4 = scmp.lt.u32.totalorder %s892_s8, %s1103_s9 }
 0x3eb   :  { %p898_p5 = pnand %p896_p4, %p893_p3 }
 0x3ed   :  { %901 = shalt.err (!%p898_p5)
}
 0x3ee   :  { %587 = dma.vmem_to_hbm [thread:$0]  %s585_s12, 128, %s1103_s9, [#allocation4]  }
 0x3ef   :  { %908 = dma.done.wait [#allocation4], 128  }
 0x3f0   :  { %909 = vsyncadd [#allocation4], 4294967168 }
 0x3f1   :  { %591 = vsyncpa [#allocation3], 1 }
 0x3f2   :  { %592 = vsyncpa [#allocation6], 1 }
 0x3f3   :  { %593 = vsyncpa [#allocation9], 1 }
 0x3f4   :  { %594 = vsyncpa [#allocation4], 1 }

</bundles_post_ra>
